<compile_context>
chip_gen: v7x
topology: tpu7x:2x2x1
jax: 0.10.0
libtpu: 0.0.40
codegen_flags: <defaults>
</compile_context>

<pallas_src>
import functools

import jax
import jax.numpy as jnp
from jax.experimental import pallas as pl
from jax.experimental.pallas import tpu as pltpu


def _depthwise_kernel(x_ref, w_ref, o_ref, *, C, KH, KW):
    """Fused-lane depthwise conv tap loop.

    x_ref: (bn, Hp, Wp*C)  padded input, input channels pre-replicated to C = C_out.
    w_ref: (KH, KW, Wo*C)  per-tap lane-vector filter (each tap's C_out weights tiled
                           across Wo so the multiply is a plain lane-wise vmul).
    o_ref: (bn, Ho, Wo*C)  output, last dim a multiple of 128 -> unmasked stores.
    """
    bn, Ho, WoC = o_ref.shape

    # Hoisted: load (+ f32 cast, a no-op for f32 inputs) the whole filter once.
    wv = w_ref[...].astype(jnp.float32)                       # (KH, KW, Wo*C)

    acc = jnp.zeros((bn, Ho, WoC), jnp.float32)
    for kw in range(KW):
        # The kw shift is an offset along the fused (W*C) lane axis; apply it once per kw
        # at the load (hoisted out of the kh loop) instead of KH*KW misaligned windows.
        xk = x_ref[:, :, kw * C: kw * C + WoC].astype(jnp.float32)   # (bn, Hp, Wo*C)
        for kh in range(KH):
            win = xk[:, kh: kh + Ho, :]                       # row/sublane offset only
            acc = acc + win * wv[kh: kh + 1, kw: kw + 1, :]   # lane-dense VPU FMA per tap
    o_ref[...] = acc.astype(o_ref.dtype)


def depthwise_conv2d(x, w, padding=0):
    """PyTorch nn.Conv2d(C_in, C_out, K, padding=padding, groups=C_in, bias=False).

    x: (N, C_in, H, W); w: (C_out, 1, KH, KW), C_out = C_in * mult, oc = ic*mult + m.
    Assumes stride=1, dilation=1 (matches the module).
    """
    N, C_in, H, W = x.shape
    C_out, _, KH, KW = w.shape
    assert C_out % C_in == 0, "groups=in_channels requires C_out divisible by C_in"
    mult = C_out // C_in
    Hp, Wp = H + 2 * padding, W + 2 * padding
    Ho, Wo = Hp - KH + 1, Wp - KW + 1

    # ---- single wrapper relayout pass (XLA fuses pad/transpose/repeat/reshape): ----
    # NCHW -> (N, Hp, Wp*C_out). The pad rides along with the unavoidable layout
    # transform, so there is no standalone padded-copy HBM pass. Position
    # wo*C_out + oc of the fused lane axis holds input channel oc // mult.
    xp = jnp.pad(x, ((0, 0), (0, 0), (padding, padding), (padding, padding)))
    xf = jnp.repeat(jnp.transpose(xp, (0, 2, 3, 1)), mult, axis=-1)   # (N, Hp, Wp, C_out)
    xf = xf.reshape(N, Hp, Wp * C_out)

    # Per-tap lane-vector weights: wf[kh, kw, wo*C_out + oc] = w[oc, 0, kh, kw].
    wf = jnp.tile(jnp.transpose(w[:, 0], (1, 2, 0)), (1, 1, Wo))      # (KH, KW, Wo*C_out)

    # One grid step holds the whole toy problem (per-step overhead ~0.35us); for large
    # shapes, tile the batch (and H) here and re-derive block sizes against VMEM
    # (budget ~24-28 MiB on v7x's 64 MiB VMEM with double buffering).
    bn = N
    grid = (N // bn,)

    kernel = functools.partial(_depthwise_kernel, C=C_out, KH=KH, KW=KW)
    cost = pl.CostEstimate(
        flops=2 * N * C_out * Ho * Wo * KH * KW,
        transcendentals=0,
        bytes_accessed=(xf.size + wf.size + N * Ho * Wo * C_out) * x.dtype.itemsize,
    )

    out_f = pl.pallas_call(
        kernel,
        out_shape=jax.ShapeDtypeStruct((N, Ho, Wo * C_out), x.dtype),
        grid=grid,
        in_specs=[
            # whole fused input per grid step: read exactly once, never per output channel
            pl.BlockSpec((bn, Hp, Wp * C_out), lambda b: (b, 0, 0)),
            # tiny pre-tiled filter (KH, KW, Wo*C_out), resident for the whole step
            pl.BlockSpec((KH, KW, Wo * C_out), lambda b: (0, 0, 0)),
        ],
        # last block dim = Wo*C_out (multiple of 128) -> unmasked, lane-dense stores
        out_specs=pl.BlockSpec((bn, Ho, Wo * C_out), lambda b: (b, 0, 0)),
        compiler_params=pltpu.CompilerParams(dimension_semantics=("parallel",)),
        cost_estimate=cost,
    )(xf, wf)

    # Restore PyTorch NCHW; this transpose also un-interleaves (wo, oc) from the lanes.
    return jnp.transpose(out_f.reshape(N, Ho, Wo, C_out), (0, 3, 1, 2))


if __name__ == "__main__":
    # Module config: DepthwiseConv2d(in_channels=4, out_channels=4, kernel_size=3,
    #                                depth=2, padding=1, bias=False)
    N, C_in, H, W = 2, 4, 16, 16
    out_channels, depth, K, padding = 4, 2, 3, 1
    C_out = out_channels * depth  # groups=C_in -> weight (C_out, 1, K, K)

    key = jax.random.PRNGKey(0)
    kx, kw_key = jax.random.split(key)
    x = jax.random.normal(kx, (N, C_in, H, W), dtype=jnp.float32)
    # Deterministic synthetic init (PyTorch default would be kaiming-uniform).
    w = jax.random.normal(kw_key, (C_out, 1, K, K), dtype=jnp.float32) * 0.1

    out = depthwise_conv2d(x, w, padding=padding)
    out = jax.block_until_ready(out)

    # Cross-check against XLA's grouped conv (same semantics as the PyTorch module).
    ref = jax.lax.conv_general_dilated(
        x, w,
        window_strides=(1, 1),
        padding=((padding, padding), (padding, padding)),
        dimension_numbers=("NCHW", "OIHW", "NCHW"),
        feature_group_count=C_in,
    )
    assert out.shape == (N, C_out, H, W)
    assert jnp.allclose(out, ref, atol=1e-4, rtol=1e-4)
    print("KERNEL_OK")
</pallas_src>

<mosaic_0001>
module attributes {stable_mosaic.version = 11 : i64} {
  func.func @_depthwise_kernel(%arg0: i32, %arg1: memref<2x18x144xf32, #tpu.memory_space<vmem>>, %arg2: memref<3x3x128xf32, #tpu.memory_space<vmem>>, %arg3: memref<2x16x128xf32, #tpu.memory_space<vmem>>) attributes {dimension_semantics = [#tpu.dimension_semantics<parallel>], iteration_bounds = array<i64: 1>, scalar_prefetch = 0 : i64, scratch_operands = 0 : i64, tpu.core_type = #tpu.core_type<tc>, window_params = [{transform_indices = @transform_0, window_bounds = array<i64: 2, 18, 144>}, {pipeline_mode = #tpu.pipeline_mode<synchronous>, transform_indices = @transform_1, window_bounds = array<i64: 3, 3, 128>}, {transform_indices = @transform_2, window_bounds = array<i64: 2, 16, 128>}]} {
    %c0 = arith.constant 0 : index
    %c0_0 = arith.constant 0 : index
    %c0_1 = arith.constant 0 : index
    %0 = vector.load %arg2[%c0, %c0_0, %c0_1] : memref<3x3x128xf32, #tpu.memory_space<vmem>>, vector<3x3x128xf32>
    %cst = arith.constant 0.000000e+00 : f32
    %1 = vector.broadcast %cst : f32 to vector<2x16x128xf32>
    %c0_2 = arith.constant 0 : index
    %c0_3 = arith.constant 0 : index
    %c0_4 = arith.constant 0 : index
    %2 = vector.load %arg1[%c0_2, %c0_3, %c0_4] : memref<2x18x144xf32, #tpu.memory_space<vmem>>, vector<2x18x128xf32>
    %3 = vector.extract_strided_slice %2 {offsets = [0, 0, 0], sizes = [2, 16, 128], strides = [1, 1, 1]} : vector<2x18x128xf32> to vector<2x16x128xf32>
    %4 = vector.extract_strided_slice %0 {offsets = [0, 0, 0], sizes = [1, 1, 128], strides = [1, 1, 1]} : vector<3x3x128xf32> to vector<1x1x128xf32>
    %5 = vector.broadcast %4 : vector<1x1x128xf32> to vector<2x16x128xf32>
    %6 = arith.mulf %3, %5 : vector<2x16x128xf32>
    %7 = arith.addf %1, %6 : vector<2x16x128xf32>
    %8 = vector.extract_strided_slice %2 {offsets = [0, 1, 0], sizes = [2, 16, 128], strides = [1, 1, 1]} : vector<2x18x128xf32> to vector<2x16x128xf32>
    %9 = vector.extract_strided_slice %0 {offsets = [1, 0, 0], sizes = [1, 1, 128], strides = [1, 1, 1]} : vector<3x3x128xf32> to vector<1x1x128xf32>
    %10 = vector.broadcast %9 : vector<1x1x128xf32> to vector<2x16x128xf32>
    %11 = arith.mulf %8, %10 : vector<2x16x128xf32>
    %12 = arith.addf %7, %11 : vector<2x16x128xf32>
    %13 = vector.extract_strided_slice %2 {offsets = [0, 2, 0], sizes = [2, 16, 128], strides = [1, 1, 1]} : vector<2x18x128xf32> to vector<2x16x128xf32>
    %14 = vector.extract_strided_slice %0 {offsets = [2, 0, 0], sizes = [1, 1, 128], strides = [1, 1, 1]} : vector<3x3x128xf32> to vector<1x1x128xf32>
    %15 = vector.broadcast %14 : vector<1x1x128xf32> to vector<2x16x128xf32>
    %16 = arith.mulf %13, %15 : vector<2x16x128xf32>
    %17 = arith.addf %12, %16 : vector<2x16x128xf32>
    %c0_5 = arith.constant 0 : index
    %c0_6 = arith.constant 0 : index
    %c8 = arith.constant 8 : index
    %18 = vector.load %arg1[%c0_5, %c0_6, %c8] : memref<2x18x144xf32, #tpu.memory_space<vmem>>, vector<2x18x128xf32>
    %19 = vector.extract_strided_slice %18 {offsets = [0, 0, 0], sizes = [2, 16, 128], strides = [1, 1, 1]} : vector<2x18x128xf32> to vector<2x16x128xf32>
    %20 = vector.extract_strided_slice %0 {offsets = [0, 1, 0], sizes = [1, 1, 128], strides = [1, 1, 1]} : vector<3x3x128xf32> to vector<1x1x128xf32>
    %21 = vector.broadcast %20 : vector<1x1x128xf32> to vector<2x16x128xf32>
    %22 = arith.mulf %19, %21 : vector<2x16x128xf32>
    %23 = arith.addf %17, %22 : vector<2x16x128xf32>
    %24 = vector.extract_strided_slice %18 {offsets = [0, 1, 0], sizes = [2, 16, 128], strides = [1, 1, 1]} : vector<2x18x128xf32> to vector<2x16x128xf32>
    %25 = vector.extract_strided_slice %0 {offsets = [1, 1, 0], sizes = [1, 1, 128], strides = [1, 1, 1]} : vector<3x3x128xf32> to vector<1x1x128xf32>
    %26 = vector.broadcast %25 : vector<1x1x128xf32> to vector<2x16x128xf32>
    %27 = arith.mulf %24, %26 : vector<2x16x128xf32>
    %28 = arith.addf %23, %27 : vector<2x16x128xf32>
    %29 = vector.extract_strided_slice %18 {offsets = [0, 2, 0], sizes = [2, 16, 128], strides = [1, 1, 1]} : vector<2x18x128xf32> to vector<2x16x128xf32>
    %30 = vector.extract_strided_slice %0 {offsets = [2, 1, 0], sizes = [1, 1, 128], strides = [1, 1, 1]} : vector<3x3x128xf32> to vector<1x1x128xf32>
    %31 = vector.broadcast %30 : vector<1x1x128xf32> to vector<2x16x128xf32>
    %32 = arith.mulf %29, %31 : vector<2x16x128xf32>
    %33 = arith.addf %28, %32 : vector<2x16x128xf32>
    %c0_7 = arith.constant 0 : index
    %c0_8 = arith.constant 0 : index
    %c16 = arith.constant 16 : index
    %34 = vector.load %arg1[%c0_7, %c0_8, %c16] : memref<2x18x144xf32, #tpu.memory_space<vmem>>, vector<2x18x128xf32>
    %35 = vector.extract_strided_slice %34 {offsets = [0, 0, 0], sizes = [2, 16, 128], strides = [1, 1, 1]} : vector<2x18x128xf32> to vector<2x16x128xf32>
    %36 = vector.extract_strided_slice %0 {offsets = [0, 2, 0], sizes = [1, 1, 128], strides = [1, 1, 1]} : vector<3x3x128xf32> to vector<1x1x128xf32>
    %37 = vector.broadcast %36 : vector<1x1x128xf32> to vector<2x16x128xf32>
    %38 = arith.mulf %35, %37 : vector<2x16x128xf32>
    %39 = arith.addf %33, %38 : vector<2x16x128xf32>
    %40 = vector.extract_strided_slice %34 {offsets = [0, 1, 0], sizes = [2, 16, 128], strides = [1, 1, 1]} : vector<2x18x128xf32> to vector<2x16x128xf32>
    %41 = vector.extract_strided_slice %0 {offsets = [1, 2, 0], sizes = [1, 1, 128], strides = [1, 1, 1]} : vector<3x3x128xf32> to vector<1x1x128xf32>
    %42 = vector.broadcast %41 : vector<1x1x128xf32> to vector<2x16x128xf32>
    %43 = arith.mulf %40, %42 : vector<2x16x128xf32>
    %44 = arith.addf %39, %43 : vector<2x16x128xf32>
    %45 = vector.extract_strided_slice %34 {offsets = [0, 2, 0], sizes = [2, 16, 128], strides = [1, 1, 1]} : vector<2x18x128xf32> to vector<2x16x128xf32>
    %46 = vector.extract_strided_slice %0 {offsets = [2, 2, 0], sizes = [1, 1, 128], strides = [1, 1, 1]} : vector<3x3x128xf32> to vector<1x1x128xf32>
    %47 = vector.broadcast %46 : vector<1x1x128xf32> to vector<2x16x128xf32>
    %48 = arith.mulf %45, %47 : vector<2x16x128xf32>
    %49 = arith.addf %44, %48 : vector<2x16x128xf32>
    %c0_9 = arith.constant 0 : index
    %c0_10 = arith.constant 0 : index
    %c0_11 = arith.constant 0 : index
    %50 = vector.load %arg3[%c0_9, %c0_10, %c0_11] : memref<2x16x128xf32, #tpu.memory_space<vmem>>, vector<2x16x128xf32>
    tpu.vector_store %arg3[%c0_9, %c0_10, %c0_11], %49 {strides = array<i32>} : memref<2x16x128xf32, #tpu.memory_space<vmem>>, vector<2x16x128xf32>,
    return
  }
  func.func @transform_0(%arg0: i32) -> (i32, i32, i32) {
    %c0_i32 = arith.constant 0 : i32
    %c0_i32_0 = arith.constant 0 : i32
    %c0_i32_1 = arith.constant 0 : i32
    return %arg0, %c0_i32, %c0_i32_0 : i32, i32, i32
  }
  func.func @transform_1(%arg0: i32) -> (i32, i32, i32) {
    %c0_i32 = arith.constant 0 : i32
    %c0_i32_0 = arith.constant 0 : i32
    %c0_i32_1 = arith.constant 0 : i32
    %c0_i32_2 = arith.constant 0 : i32
    return %c0_i32, %c0_i32_0, %c0_i32_1 : i32, i32, i32
  }
  func.func @transform_2(%arg0: i32) -> (i32, i32, i32) {
    %c0_i32 = arith.constant 0 : i32
    %c0_i32_0 = arith.constant 0 : i32
    %c0_i32_1 = arith.constant 0 : i32
    return %arg0, %c0_i32, %c0_i32_0 : i32, i32, i32
  }
}

</mosaic_0001>

<bundles_post_ra>
// kernel: tpu_custom_call.1
= control target key start
LH: loop header
LB: loop body
LE: loop exit
PB: predicated region body
PF: predicated region fallthrough
CT: control target
= control target key end

     0   :  { %v21_v0 = vlaneseq  ;;  %s1054_s0 = inlined_call_operand.vmem [shape: f32[2,18,144], index: 0, kind: input, shape index: {}]   ;;  %s1055_s1 = inlined_call_operand.vmem [shape: f32[3,3,128], index: 1, kind: input, shape index: {}]   ;;  %s1056_s2 = inlined_call_operand.hbm [shape: f32[2,16,128], index: 2, kind: output, shape index: {}]  }
   0x1   :  { %v13_v2 = vld [vmem:[%s1055_s1 + $0x4] sm:$0x7]  ;;  %v14_v5 = vld [vmem:[%s1055_s1 + $0x8] sm:$0x7]  ;;  %v12_v6 = vld [vmem:[%s1055_s1] sm:$0x7] }
   0x2   :  { %v22_v1 = vshrl.u32 %v21_v0, 7 }
   0x4   :  { %v23_v3 = vsub.s32 0, %v22_v1  ;;  %v111_v4 = vsub.s32 1, %v22_v1 }
   0x6   :  { %v165_v7 = vrot.slane %v13_v2, %v111_v4  ;;  %v615_v8 = vrot.slane %v13_v2, %v23_v3  ;;  %v617_v9 = vrot.slane %v12_v6, %v23_v3 }
   0x7   :  { %7 = vsyncpa [#allocation3], 0  ;;  %v324_v10 = vsub.s32 2, %v22_v1  ;;  %v245_v11 = vrot.slane %v14_v5, %v111_v4  ;;  %v619_v12 = vrot.slane %v14_v5, %v23_v3  ;;  %s585_s15 = smov 8   ;;  %v112_v13 = vrot.slane %v12_v6, %v111_v4  ;;  %s586_s1 = smov 16   ;;  %v627_v17 = vld [vmem:[%s1054_s0] sm:$0xff] }
   0x8   :  { %167 = vrot.lane.b32.xlu0 %v165_v7, %s585_s15  ;;  %v632_v18 = vld [vmem:[%s1054_s0 + $0x10] sm:$0xff]  ;;  %v37_v19 = vmul.f32 %v615_v8, %v627_v17  ;;  %v25_v23 = vmul.f32 %v617_v9, %v627_v17  ;;  %vm49_vm0 = vcmask 1046528   ;;  %v653_v28 = vld [vmem:[%s1054_s0 + $0x20] sm:$0x3]  ;;  %vm84_vm1 = vcmask 1045504   ;;  %v680_v38 = vld [vmem:[%s1054_s0 + $0x8] sm:$0xff] }
   0x9   :  { %247 = vrot.lane.b32.xlu1 %v245_v11, %s585_s15  ;;  %v378_v14 = vrot.slane %v13_v2, %v324_v10  ;;  %v325_v15 = vrot.slane %v12_v6, %v324_v10  ;;  %v458_v16 = vrot.slane %v14_v5, %v324_v10  ;;  %v638_v20 = vmul.f32 %v615_v8, %v632_v18  ;;  %s587_s24 = smov 120   ;;  %v689_v41 = vld [vmem:[%s1054_s0 + $0x18] sm:$0xff]  ;;  %v703_v45 = vld [vmem:[%s1054_s0 + $0x30] sm:$0xff]  ;;  %v712_v48 = vld [vmem:[%s1054_s0 + $0x48] sm:$0xff]  ;;  %s588_s7 = smov 112  }
   0xa   :  { %v72_v21 = vmul.f32 %v619_v12, %v627_v17  ;;  %v644_v22 = vmul.f32 %v619_v12, %v632_v18  ;;  %v50_v24 = vrot.slane %v37_v19, 1  ;;  %v663_v31 = vmul.f32 %v615_v8, %v653_v28  ;;  %v698_v44 = vld [vmem:[%s1054_s0 + $0x38] sm:$0xff]  ;;  %v717_v49 = vld [vmem:[%s1054_s0 + $0x40] sm:$0xff]  ;;  %v738_v59 = vld [vmem:[%s1054_s0 + $0x28] sm:$0x3] }
   0xb   :  { %v51_v25 = vrot.slane %v638_v20, 1  ;;  %v667_v32 = vmul.f32 %v619_v12, %v653_v28  ;;  %v671_v34 = vmul.f32 %v617_v9, %v632_v18  ;;  %vm149_vm2 = vcmask 982016  }
   0xc   :  { %114 = vrot.lane.b32.xlu0 %v112_v13, %s585_s15  ;;  %v85_v26 = vrot.slane %v72_v21, 2  ;;  %v86_v27 = vrot.slane %v644_v22, 2  ;;  %v53_v1 = vrot.slane %v663_v31, 1  ;;  %v844_v22 = vld [vmem:[%s1054_s0 + $0x58] sm:$0x3]  ;;  %vm362_vm3 = vcmask 916480  }
   0xd   :  { %380 = vrot.lane.b32.xlu1 %v378_v14, %s586_s1  ;;  %v52_v29 = vsel %vm49_vm0, %v50_v24, %v51_v25  ;;  %v88_v5 = vrot.slane %v667_v32, 2 }
   0xe   :  { %v87_v30 = vsel %vm84_vm1, %v85_v26, %v86_v27  ;;  %v64_v33 = vadd.f32 %v52_v29, %v25_v23 }
  0x10   :  { %327 = vrot.lane.b32.xlu0 %v325_v15, %s586_s1  ;;  %v675_v36 = vadd.f32 %v87_v30, %v64_v33 }
  0x11   :  { %460 = vrot.lane.b32.xlu1 %v458_v16, %s586_s1 }
  0x7a   :  { %v673_v35 = vpop.permute.xlu0 %167 }
  0x7b   :  { %v719_v51 = vpop.permute.xlu1 %247  ;;  %v171_v57 = vmul.f32 %v673_v35, %v680_v38  ;;  %v173_v58 = vmul.f32 %v673_v35, %v689_v41  ;;  %v170_v60 = vmul.f32 %v673_v35, %v627_v17  ;;  %v172_v61 = vmul.f32 %v673_v35, %v632_v18 }
  0x7c   :  { %v175_v2 = vmul.f32 %v673_v35, %v738_v59  ;;  %v174_v3 = vmul.f32 %v673_v35, %v653_v28  ;;  %v755_v4 = vmul.f32 %v673_v35, %v698_v44  ;;  %v762_v10 = vmul.f32 %v673_v35, %v712_v48 }
  0x7d   :  { %v197_v6 = vrot.slane %v171_v57, 1  ;;  %v198_v7 = vrot.slane %v173_v58, 1  ;;  %v194_v13 = vrot.slane %v170_v60, 1  ;;  %v195_v14 = vrot.slane %v172_v61, 1 }
  0x7e   :  { %v115_v37 = vpop.permute.xlu0 %114  ;;  %v202_v26 = vrot.slane %v175_v2, 1  ;;  %v200_v29 = vrot.slane %v174_v3, 1  ;;  %v207_v32 = vrot.slane %v755_v4, 1  ;;  %v208_v33 = vrot.slane %v762_v10, 1 }
  0x7f   :  { %v118_v39 = vmul.f32 %v115_v37, %v680_v38  ;;  %v117_v40 = vmul.f32 %v115_v37, %v627_v17  ;;  %v120_v42 = vmul.f32 %v115_v37, %v689_v41  ;;  %v119_v43 = vmul.f32 %v115_v37, %v632_v18  ;;  %v727_v56 = vpop.permute.xlu1 %380 }
  0x80   :  { %v122_v46 = vmul.f32 %v115_v37, %v698_v44  ;;  %v121_v47 = vmul.f32 %v115_v37, %v703_v45  ;;  %v124_v52 = vmul.f32 %v115_v37, %v712_v48  ;;  %v123_v53 = vmul.f32 %v115_v37, %v717_v49 }
  0x81   :  { %135 = vrot.lane.b32.xlu1 %v118_v39, %s587_s24  ;;  %133 = vrot.lane.b32.xlu0 %v117_v40, %s587_s24  ;;  %v176_v57 = vmul.f32 %v673_v35, %v703_v45  ;;  %v178_v61 = vmul.f32 %v673_v35, %v717_v49  ;;  %v203_v2 = vsel %vm49_vm0, %v198_v7, %v202_v26 }
  0x82   :  { %v328_v50 = vpop.permute.xlu0 %327  ;;  %v259_v10 = vmul.f32 %v719_v51, %v712_v48 }
  0x83   :  { %v331_v54 = vmul.f32 %v328_v50, %v680_v38  ;;  %v330_v55 = vmul.f32 %v328_v50, %v627_v17  ;;  %v744_v62 = vpop.permute.xlu1 %460  ;;  %v333_v63 = vmul.f32 %v328_v50, %v689_v41  ;;  %v332_v0 = vmul.f32 %v328_v50, %v632_v18 }
  0x84   :  { %v464_v11 = vmul.f32 %v744_v62, %v680_v38  ;;  %v768_v15 = vmul.f32 %v744_v62, %v689_v41  ;;  %v463_v16 = vmul.f32 %v744_v62, %v627_v17  ;;  %v335_v19 = vmul.f32 %v328_v50, %v698_v44 }
  0x85   :  { %139 = vrot.lane.b32.xlu1 %v120_v42, %s587_s24  ;;  %137 = vrot.lane.b32.xlu0 %v119_v43, %s587_s24  ;;  %v334_v21 = vmul.f32 %v328_v50, %v703_v45  ;;  %v776_v24 = vmul.f32 %v744_v62, %v632_v18  ;;  %v470_v39 = vmul.f32 %v744_v62, %v698_v44 }
  0x86   :  { %v490_v23 = vrot.slane %v464_v11, 2  ;;  %v491_v30 = vrot.slane %v768_v15, 2  ;;  %v487_v31 = vrot.slane %v463_v16, 2  ;;  %v337_v40 = vmul.f32 %v328_v50, %v712_v48 }
  0x87   :  { %v488_v37 = vrot.slane %v776_v24, 2  ;;  %v794_v43 = vmul.f32 %v744_v62, %v712_v48  ;;  %v205_v16 = vrot.slane %v178_v61, 1 }
  0x88   :  { %v790_v42 = vsel %vm84_vm1, %v490_v23, %v491_v30  ;;  %v27_v23 = vmul.f32 %v617_v9, %v703_v45 }
  0x89   :  { %143 = vrot.lane.b32.xlu1 %v122_v46, %s587_s24  ;;  %141 = vrot.lane.b32.xlu0 %v121_v47, %s587_s24  ;;  %v469_v46 = vmul.f32 %v744_v62, %v703_v45  ;;  %v336_v47 = vmul.f32 %v328_v50, %v717_v49  ;;  %v501_v58 = vrot.slane %v794_v43, 2  ;;  %v196_v50 = vsel %vm49_vm0, %v194_v13, %v195_v14 }
  0x8a   :  { %v201_v13 = vsel %vm49_vm0, %v195_v14, %v200_v29  ;;  %v76_v14 = vmul.f32 %v619_v12, %v717_v49 }
  0x8b   :  { %v497_v60 = vrot.slane %v469_v46, 2 }
  0x8c   :  { %v91_v29 = vrot.slane %v76_v14, 2 }
  0x8d   :  { %147 = vrot.lane.b32.xlu1 %v124_v52, %s587_s24  ;;  %145 = vrot.lane.b32.xlu0 %v123_v53, %s587_s24  ;;  %v802_v52 = vsel %vm84_vm1, %v487_v31, %v488_v37  ;;  %v500_v53 = vrot.slane %v470_v39, 2 }
  0x8f   :  { %v825_v3 = vsel %vm84_vm1, %v500_v53, %v501_v58  ;;  %v28_v53 = vmul.f32 %v617_v9, %v717_v49  ;;  %v252_v9 = vmul.f32 %v719_v51, %v632_v18 }
  0x91   :  { %348 = vrot.lane.b32.xlu1 %v331_v54, %s588_s7  ;;  %346 = vrot.lane.b32.xlu0 %v330_v55, %s588_s7  ;;  %v806_v54 = vmul.f32 %v744_v62, %v717_v49  ;;  %v199_v55 = vsel %vm49_vm0, %v197_v6, %v198_v7  ;;  %v89_v6 = vsel %vm84_vm1, %v86_v27, %v88_v5  ;;  %v204_v7 = vrot.slane %v176_v57, 1  ;;  %v849_v27 = vld [vmem:[%s1054_s0 + $0x50] sm:$0x3]  ;;  %s589_s0 = smov [#allocation2]  }
  0x92   :  { %v75_v5 = vmul.f32 %v619_v12, %v703_v45  ;;  %v42_v31 = vmul.f32 %v615_v8, %v849_v27  ;;  %v77_v39 = vmul.f32 %v619_v12, %v849_v27  ;;  %v180_v46 = vmul.f32 %v673_v35, %v849_v27  ;;  %s544_s14 = sshll.u32 %s589_s0, 4  ;;  %s545_s14 = int_to_ptr.vmem [resolvable:$true] %s544_s14 }
  0x93   :  { %v253_v12 = vmul.f32 %v719_v51, %v689_v41  ;;  %s561_s1 = scalar_lea.vmem %s545_s14, 512  ;;  %p566_p1 = scmp.lt.s32.totalorder %s545_s14, %s545_s14 }
  0x94   :  { %v90_v26 = vrot.slane %v75_v5, 2  ;;  %p562_p0 = scmp.ne.s32.totalorder %s545_s14, %s561_s1  ;;  %p567_p2 = scmp.lt.s32.totalorder %s561_s1, %s561_s1 }
  0x95   :  { %352 = vrot.lane.b32.xlu1 %v333_v63, %s588_s7  ;;  %350 = vrot.lane.b32.xlu0 %v332_v0, %s588_s7  ;;  %v498_v63 = vrot.slane %v806_v54, 2  ;;  %v54_v0 = vsel %vm49_vm0, %v51_v25, %v53_v1  ;;  %v40_v25 = vmul.f32 %v615_v8, %v703_v45  ;;  %v41_v1 = vmul.f32 %v615_v8, %v717_v49 }
  0x96   :  { %v65_v11 = vadd.f32 %v54_v0, %v671_v34  ;;  %v251_v8 = vmul.f32 %v719_v51, %v680_v38  ;;  %p568_p3 = por %p567_p2, %p566_p1 }
  0x97   :  { %v835_v20 = vsel %vm84_vm1, %v497_v60, %v498_v63  ;;  %v58_v60 = vrot.slane %v42_v31, 1 }
  0x98   :  { %v851_v34 = vadd.f32 %v89_v6, %v65_v11  ;;  %v209_v11 = vsel %vm49_vm0, %v207_v32, %v208_v33  ;;  %v277_v14 = vrot.slane %v251_v8, 2  ;;  %p569_p4 = pnand %p568_p3, %p562_p0 }
  0x99   :  { %356 = vrot.lane.b32.xlu1 %v335_v19, %s588_s7  ;;  %354 = vrot.lane.b32.xlu0 %v334_v21, %s588_s7  ;;  %v55_v19 = vrot.slane %v40_v25, 1  ;;  %v56_v21 = vrot.slane %v41_v1, 1  ;;  %v210_v1 = vrot.slane %v180_v46, 1  ;;  %v258_v46 = vmul.f32 %v719_v51, %v717_v49 }
  0x9b   :  { %v59_v0 = vsel %vm49_vm0, %v56_v21, %v58_v60  ;;  %v211_v32 = vsel %vm49_vm0, %v205_v16, %v210_v1  ;;  %v285_v8 = vrot.slane %v258_v46, 2 }
  0x9c   :  { %v67_v6 = vadd.f32 %v59_v0, %v28_v53  ;;  %v383_v0 = vmul.f32 %v727_v56, %v627_v17 }
  0x9d   :  { %360 = vrot.lane.b32.xlu1 %v337_v40, %s588_s7  ;;  %358 = vrot.lane.b32.xlu0 %v336_v47, %s588_s7  ;;  %v181_v40 = vmul.f32 %v673_v35, %v844_v22  ;;  %v57_v47 = vsel %vm49_vm0, %v55_v19, %v56_v21  ;;  %v250_v35 = vmul.f32 %v719_v51, %v627_v17  ;;  %v278_v19 = vrot.slane %v253_v12, 2 }
  0x9e   :  { %v66_v57 = vadd.f32 %v57_v47, %v27_v23  ;;  %v275_v23 = vrot.slane %v252_v9, 2  ;;  %v260_v12 = vmul.f32 %v719_v51, %v849_v27  ;;  %v386_v9 = vmul.f32 %v727_v56, %v689_v41 }
  0x9f   :  { %v212_v25 = vrot.slane %v181_v40, 1  ;;  %v274_v21 = vrot.slane %v250_v35, 2  ;;  %v257_v40 = vmul.f32 %v719_v51, %v698_v44  ;;  %v384_v35 = vmul.f32 %v727_v56, %v680_v38 }
  0xa0   :  { %v407_v1 = vrot.slane %v383_v0, 1  ;;  %v388_v17 = vmul.f32 %v727_v56, %v738_v59 }
  0xa1   :  { %216 = vrot.lane.b32.xlu1 %v199_v55, %s587_s24  ;;  %214 = vrot.lane.b32.xlu0 %v196_v50, %s587_s24  ;;  %v92_v55 = vsel %vm84_vm1, %v90_v26, %v91_v29  ;;  %v93_v50 = vrot.slane %v77_v39, 2  ;;  %v255_v26 = vmul.f32 %v719_v51, %v738_v59  ;;  %v213_v4 = vsel %vm49_vm0, %v208_v33, %v212_v25 }
  0xa2   :  { %v883_v61 = vadd.f32 %v92_v55, %v66_v57  ;;  %v276_v31 = vsel %vm84_vm1, %v274_v21, %v275_v23  ;;  %v287_v53 = vrot.slane %v257_v40, 2  ;;  %v288_v55 = vrot.slane %v259_v10, 2 }
  0xa3   :  { %v282_v39 = vrot.slane %v255_v26, 2  ;;  %v261_v57 = vmul.f32 %v719_v51, %v844_v22  ;;  %v410_v38 = vrot.slane %v384_v35, 1  ;;  %v411_v25 = vrot.slane %v386_v9, 1 }
  0xa4   :  { %v415_v26 = vrot.slane %v388_v17, 1  ;;  %v473_v35 = vmul.f32 %v744_v62, %v849_v27 }
  0xa5   :  { %220 = vrot.lane.b32.xlu1 %v203_v2, %s587_s24  ;;  %218 = vrot.lane.b32.xlu0 %v201_v13, %s587_s24  ;;  %v94_v2 = vsel %vm84_vm1, %v91_v29, %v93_v50  ;;  %v206_v13 = vsel %vm49_vm0, %v204_v7, %v205_v16  ;;  %v254_v7 = vmul.f32 %v719_v51, %v653_v28 }
  0xa6   :  { %v895_v5 = vadd.f32 %v94_v2, %v67_v6  ;;  %v279_v29 = vsel %vm84_vm1, %v277_v14, %v278_v19  ;;  %v256_v16 = vmul.f32 %v719_v51, %v703_v45  ;;  %v283_v47 = vsel %vm84_vm1, %v278_v19, %v282_v39 }
  0xa7   :  { %v280_v33 = vrot.slane %v254_v7, 2  ;;  %v385_v2 = vmul.f32 %v727_v56, %v632_v18  ;;  %v289_v6 = vsel %vm84_vm1, %v287_v53, %v288_v55  ;;  %v387_v19 = vmul.f32 %v727_v56, %v653_v28 }
  0xa8   :  { %v284_v50 = vrot.slane %v256_v16, 2  ;;  %v412_v21 = vsel %vm49_vm0, %v410_v38, %v411_v25  ;;  %v389_v7 = vmul.f32 %v727_v56, %v703_v45  ;;  %v416_v39 = vsel %vm49_vm0, %v411_v25, %v415_v26 }
  0xa9   :  { %224 = vrot.lane.b32.xlu1 %v209_v11, %s587_s24  ;;  %222 = vrot.lane.b32.xlu0 %v206_v13, %s587_s24  ;;  %v281_v60 = vsel %vm84_vm1, %v275_v23, %v280_v33  ;;  %v292_v11 = vrot.slane %v261_v57, 2  ;;  %v290_v13 = vrot.slane %v260_v12, 2  ;;  %v408_v41 = vrot.slane %v385_v2, 1 }
  0xaa   :  { %v286_v51 = vsel %vm84_vm1, %v284_v50, %v285_v8  ;;  %v417_v33 = vrot.slane %v389_v7, 1  ;;  %v393_v45 = vmul.f32 %v727_v56, %v849_v27 }
  0xab   :  { %v293_v14 = vsel %vm84_vm1, %v288_v55, %v292_v11  ;;  %v291_v18 = vsel %vm84_vm1, %v285_v8, %v290_v13  ;;  %v409_v23 = vsel %vm49_vm0, %v407_v1, %v408_v41 }
  0xac   :  { %v423_v53 = vrot.slane %v393_v45, 1 }
  0xad   :  { %228 = vrot.lane.b32.xlu1 %v213_v4, %s587_s24  ;;  %226 = vrot.lane.b32.xlu0 %v211_v32, %s587_s24  ;;  %v390_v4 = vmul.f32 %v727_v56, %v698_v44  ;;  %v392_v32 = vmul.f32 %v727_v56, %v712_v48  ;;  %v394_v48 = vmul.f32 %v727_v56, %v844_v22 }
  0xaf   :  { %v420_v40 = vrot.slane %v390_v4, 1  ;;  %v421_v10 = vrot.slane %v392_v32, 1 }
  0xb1   :  { %296 = vrot.lane.b32.xlu1 %v279_v29, %s587_s24  ;;  %294 = vrot.lane.b32.xlu0 %v276_v31, %s587_s24  ;;  %v413_v29 = vrot.slane %v387_v19, 1  ;;  %v391_v31 = vmul.f32 %v727_v56, %v717_v49  ;;  %v422_v49 = vsel %vm49_vm0, %v420_v40, %v421_v10  ;;  %v468_v56 = vmul.f32 %v744_v62, %v738_v59 }
  0xb2   :  { %v474_v59 = vmul.f32 %v744_v62, %v844_v22 }
  0xb3   :  { %v414_v44 = vsel %vm49_vm0, %v408_v41, %v413_v29  ;;  %v418_v16 = vrot.slane %v391_v31, 1  ;;  %v495_v50 = vrot.slane %v468_v56, 2 }
  0xb5   :  { %300 = vrot.lane.b32.xlu1 %v283_v47, %s587_s24  ;;  %298 = vrot.lane.b32.xlu0 %v281_v60, %s587_s24  ;;  %v419_v46 = vsel %vm49_vm0, %v417_v33, %v418_v16  ;;  %v425_v47 = vrot.slane %v394_v48, 1  ;;  %v424_v57 = vsel %vm49_vm0, %v418_v16, %v423_v53  ;;  %v467_v60 = vmul.f32 %v744_v62, %v653_v28 }
  0xb6   :  { %v496_v12 = vsel %vm84_vm1, %v491_v30, %v495_v50 }
  0xb7   :  { %v426_v55 = vsel %vm49_vm0, %v421_v10, %v425_v47  ;;  %v493_v8 = vrot.slane %v467_v60, 2 }
  0xb9   :  { %304 = vrot.lane.b32.xlu1 %v289_v6, %s587_s24  ;;  %302 = vrot.lane.b32.xlu0 %v286_v51, %s587_s24  ;;  %v494_v28 = vsel %vm84_vm1, %v488_v37, %v493_v8 }
  0xbd   :  { %308 = vrot.lane.b32.xlu1 %v293_v14, %s587_s24  ;;  %306 = vrot.lane.b32.xlu0 %v291_v18, %s587_s24 }
  0xc1   :  { %429 = vrot.lane.b32.xlu1 %v412_v21, %s588_s7  ;;  %427 = vrot.lane.b32.xlu0 %v409_v23, %s588_s7 }
  0xc5   :  { %433 = vrot.lane.b32.xlu1 %v416_v39, %s588_s7  ;;  %431 = vrot.lane.b32.xlu0 %v414_v44, %s588_s7 }
  0xc9   :  { %437 = vrot.lane.b32.xlu1 %v422_v49, %s588_s7  ;;  %435 = vrot.lane.b32.xlu0 %v419_v46, %s588_s7 }
  0xcd   :  { %441 = vrot.lane.b32.xlu1 %v426_v55, %s588_s7  ;;  %439 = vrot.lane.b32.xlu0 %v424_v57, %s588_s7 }
  0xd1   :  { %509 = vrot.lane.b32.xlu1 %v790_v42, %s588_s7  ;;  %507 = vrot.lane.b32.xlu0 %v802_v52, %s588_s7  ;;  %v505_v42 = vrot.slane %v474_v59, 2  ;;  %v503_v52 = vrot.slane %v473_v35, 2 }
  0xd3   :  { %v506_v15 = vsel %vm84_vm1, %v501_v58, %v505_v42  ;;  %v504_v62 = vsel %vm84_vm1, %v498_v63, %v503_v52 }
  0xd5   :  { %513 = vrot.lane.b32.xlu1 %v496_v12, %s588_s7  ;;  %511 = vrot.lane.b32.xlu0 %v494_v28, %s588_s7 }
  0xd9   :  { %517 = vrot.lane.b32.xlu1 %v825_v3, %s588_s7  ;;  %515 = vrot.lane.b32.xlu0 %v835_v20, %s588_s7 }
  0xdd   :  { %521 = vrot.lane.b32.xlu1 %v506_v15, %s588_s7  ;;  %519 = vrot.lane.b32.xlu0 %v504_v62, %s588_s7 }
  0xf3   :  { %v136_v24 = vpop.permute.xlu1 %135  ;;  %v134_v30 = vpop.permute.xlu0 %133 }
  0xf4   :  { %v150_v37 = vsel %vm149_vm2, %v134_v30, %v136_v24 }
  0xf5   :  { %v158_v3 = vadd.f32 %v150_v37, %v675_v36 }
  0xf7   :  { %v140_v20 = vpop.permute.xlu1 %139  ;;  %v138_v22 = vpop.permute.xlu0 %137 }
  0xf8   :  { %v151_v43 = vsel %vm149_vm2, %v138_v22, %v140_v20 }
  0xf9   :  { %v159_v58 = vadd.f32 %v151_v43, %v851_v34 }
  0xfb   :  { %v144_v54 = vpop.permute.xlu1 %143  ;;  %v142_v27 = vpop.permute.xlu0 %141 }
  0xfc   :  { %v152_v63 = vsel %vm149_vm2, %v142_v27, %v144_v54 }
  0xfd   :  { %v160_v9 = vadd.f32 %v152_v63, %v883_v61 }
  0xff   :  { %v148_v0 = vpop.permute.xlu1 %147  ;;  %v146_v2 = vpop.permute.xlu0 %145 }
 0x100   :  { %v153_v6 = vsel %vm149_vm2, %v146_v2, %v148_v0 }
 0x101   :  { %v161_v51 = vadd.f32 %v153_v6, %v895_v5 }
 0x103   :  { %v349_v11 = vpop.permute.xlu1 %348  ;;  %v347_v36 = vpop.permute.xlu0 %346 }
 0x104   :  { %v363_v8 = vsel %vm362_vm3, %v347_v36, %v349_v11 }
 0x107   :  { %v353_v13 = vpop.permute.xlu1 %352  ;;  %v351_v38 = vpop.permute.xlu0 %350 }
 0x108   :  { %v364_v30 = vsel %vm362_vm3, %v351_v38, %v353_v13 }
 0x10b   :  { %v357_v25 = vpop.permute.xlu1 %356  ;;  %v355_v1 = vpop.permute.xlu0 %354 }
 0x10c   :  { %v365_v2 = vsel %vm362_vm3, %v355_v1, %v357_v25 }
 0x10f   :  { %v1015_v41 = vpop.permute.xlu1 %360  ;;  %v1017_v34 = vpop.permute.xlu0 %358 }
 0x113   :  { %v217_v17 = vpop.permute.xlu1 %216  ;;  %v215_v14 = vpop.permute.xlu0 %214 }
 0x114   :  { %v230_v48 = vsel %vm149_vm2, %v215_v14, %v217_v17 }
 0x115   :  { %v238_v49 = vadd.f32 %v230_v48, %v158_v3 }
 0x117   :  { %v221_v18 = vpop.permute.xlu1 %220  ;;  %v219_v61 = vpop.permute.xlu0 %218 }
 0x118   :  { %v231_v53 = vsel %vm149_vm2, %v219_v61, %v221_v18 }
 0x119   :  { %v239_v56 = vadd.f32 %v231_v53, %v159_v58 }
 0x11b   :  { %v225_v19 = vpop.permute.xlu1 %224  ;;  %v223_v21 = vpop.permute.xlu0 %222 }
 0x11c   :  { %v232_v12 = vsel %vm149_vm2, %v223_v21, %v225_v19 }
 0x11d   :  { %v240_v52 = vadd.f32 %v232_v12, %v160_v9 }
 0x11f   :  { %v229_v23 = vpop.permute.xlu1 %228  ;;  %v227_v26 = vpop.permute.xlu0 %226 }
 0x120   :  { %v233_v37 = vsel %vm149_vm2, %v227_v26, %v229_v23 }
 0x121   :  { %v241_v27 = vadd.f32 %v233_v37, %v161_v51  ;;  %v366_v51 = vsel %vm362_vm3, %v1017_v34, %v1015_v41 }
 0x123   :  { %v297_v4 = vpop.permute.xlu1 %296  ;;  %v295_v5 = vpop.permute.xlu0 %294 }
 0x124   :  { %v310_v45 = vsel %vm149_vm2, %v295_v5, %v297_v4 }
 0x125   :  { %v318_v55 = vadd.f32 %v310_v45, %v238_v49 }
 0x127   :  { %v301_v32 = vpop.permute.xlu1 %300  ;;  %v299_v7 = vpop.permute.xlu0 %298  ;;  %v371_v35 = vadd.f32 %v363_v8, %v318_v55 }
 0x128   :  { %v311_v57 = vsel %vm149_vm2, %v299_v7, %v301_v32 }
 0x129   :  { %v319_v59 = vadd.f32 %v311_v57, %v239_v56 }
 0x12b   :  { %v305_v29 = vpop.permute.xlu1 %304  ;;  %v303_v31 = vpop.permute.xlu0 %302  ;;  %v372_v43 = vadd.f32 %v364_v30, %v319_v59 }
 0x12c   :  { %v312_v42 = vsel %vm149_vm2, %v303_v31, %v305_v29 }
 0x12d   :  { %v320_v22 = vadd.f32 %v312_v42, %v240_v52 }
 0x12f   :  { %v309_v39 = vpop.permute.xlu1 %308  ;;  %v307_v40 = vpop.permute.xlu0 %306  ;;  %v373_v13 = vadd.f32 %v365_v2, %v320_v22 }
 0x130   :  { %v313_v54 = vsel %vm149_vm2, %v307_v40, %v309_v39 }
 0x131   :  { %v321_v36 = vadd.f32 %v313_v54, %v241_v27 }
 0x133   :  { %v430_v10 = vpop.permute.xlu1 %429  ;;  %v428_v33 = vpop.permute.xlu0 %427  ;;  %v374_v25 = vadd.f32 %v366_v51, %v321_v36 }
 0x134   :  { %v443_v28 = vsel %vm362_vm3, %v428_v33, %v430_v10 }
 0x135   :  { %v451_v15 = vadd.f32 %v443_v28, %v371_v35 }
 0x137   :  { %v434_v44 = vpop.permute.xlu1 %433  ;;  %v432_v16 = vpop.permute.xlu0 %431 }
 0x138   :  { %v444_v3 = vsel %vm362_vm3, %v432_v16, %v434_v44 }
 0x139   :  { %v452_v63 = vadd.f32 %v444_v3, %v372_v43 }
 0x13b   :  { %v438_v46 = vpop.permute.xlu1 %437  ;;  %v436_v47 = vpop.permute.xlu0 %435 }
 0x13c   :  { %v445_v6 = vsel %vm362_vm3, %v436_v47, %v438_v46 }
 0x13d   :  { %v453_v17 = vadd.f32 %v445_v6, %v373_v13 }
 0x13f   :  { %v442_v60 = vpop.permute.xlu1 %441  ;;  %v440_v50 = vpop.permute.xlu0 %439 }
 0x140   :  { %v446_v61 = vsel %vm362_vm3, %v440_v50, %v442_v60 }
 0x141   :  { %v454_v21 = vadd.f32 %v446_v61, %v374_v25 }
 0x143   :  { %v510_v62 = vpop.permute.xlu1 %509  ;;  %v508_v24 = vpop.permute.xlu0 %507 }
 0x144   :  { %v523_v20 = vsel %vm362_vm3, %v508_v24, %v510_v62 }
 0x145   :  { %v531_v58 = vadd.f32 %v523_v20, %v451_v15 }
 0x147   :  { %535 = vst [vmem:[#allocation2] sm:$0xff] %v531_v58  ;;  %v514_v9 = vpop.permute.xlu1 %513  ;;  %v512_v0 = vpop.permute.xlu0 %511 }
 0x148   :  { %v524_v11 = vsel %vm362_vm3, %v512_v0, %v514_v9 }
 0x149   :  { %v532_v38 = vadd.f32 %v524_v11, %v452_v63 }
 0x14b   :  { %536 = vst [vmem:[#allocation2 + $0x8] sm:$0xff] %v532_v38  ;;  %v518_v14 = vpop.permute.xlu1 %517  ;;  %v516_v18 = vpop.permute.xlu0 %515 }
 0x14c   :  { %v525_v19 = vsel %vm362_vm3, %v516_v18, %v518_v14 }
 0x14d   :  { %v533_v1 = vadd.f32 %v525_v19, %v453_v17 }
 0x14f   :  { %537 = vst [vmem:[#allocation2 + $0x10] sm:$0xff] %v533_v1  ;;  %v522_v23 = vpop.permute.xlu1 %521  ;;  %v520_v26 = vpop.permute.xlu0 %519 }
 0x150   :  { %v526_v4 = vsel %vm362_vm3, %v520_v26, %v522_v23 }
 0x151   :  { %v534_v5 = vadd.f32 %v526_v4, %v454_v21 }
 0x153   :  { %538 = vst [vmem:[#allocation2 + $0x18] sm:$0xff] %v534_v5 }
 0x154   :  { %572 = shalt.err (!%p569_p4)
}
 0x155   :  { %s573_s18 = scalar_lea.hbm %s1056_s2, 512 }
 0x156   :  { %p574_p5 = scmp.ne.s32.totalorder %s1056_s2, %s573_s18  ;;  %p577_p6 = scmp.lt.u32.totalorder %s573_s18, %s1056_s2 }
 0x158   :  { %p579_p7 = pnand %p577_p6, %p574_p5 }
 0x15a   :  { %582 = shalt.err (!%p579_p7)
}
 0x15b   :  { %s590_s23 = smov 128  }
 0x15c   :  { %550 = dma.vmem_to_hbm [thread:$0]  %s545_s14, 512, %s1056_s2, [#allocation3], %s590_s23, %s590_s23, %s585_s15  }
 0x15d   :  { %583 = dma.done.wait [#allocation3], 512  }
 0x15e   :  { %584 = vsyncadd [#allocation3], 4294966784 }
 0x15f   :  { %554 = vsyncpa [#allocation3], 1 }

</bundles_post_ra>
